<compile_context>
chip_gen: v6e
topology: v6e:2x2x1
jax: 0.10.0
libtpu: 0.0.40
codegen_flags: <defaults>
</compile_context>

<pallas_src>
import functools

import jax
import jax.numpy as jnp
from jax.experimental import pallas as pl
from jax.experimental.pallas import tpu as pltpu


def _round_hidden(hidden_dim: int, multiple_of: int) -> int:
    hidden_dim = int(2 * hidden_dim / 3)
    hidden_dim = multiple_of * ((hidden_dim + multiple_of - 1) // multiple_of)
    return hidden_dim


def _round_up(n: int, m: int) -> int:
    return ((n + m - 1) // m) * m


def prepare_weights(w1, w2, w3, *, hidden_tile=256):
    """One-time weight packing (hoisted out of the forward hot path).

    w1, w3: [H, D], w2: [D, H]  (PyTorch nn.Linear [out, in] layout).
    Returns:
      w13 : [D, 2*H_pad]  -- per-hidden-tile interleaved [W1^T | W3^T] columns
      w2_t: [H_pad, D]    -- W2 transposed (x @ W stays a plain matmul)
      th  : hidden tile actually used (multiple of 128, divides H_pad)
    """
    H, D = w1.shape
    th = min(hidden_tile, _round_up(H, 128))
    H_pad = _round_up(H, th)
    if H_pad != H:
        pad = H_pad - H
        w1 = jnp.pad(w1, ((0, pad), (0, 0)))
        w3 = jnp.pad(w3, ((0, pad), (0, 0)))
        w2 = jnp.pad(w2, ((0, 0), (0, pad)))
    Hn = H_pad // th
    w1_t = w1.T.reshape(D, Hn, th)
    w3_t = w3.T.reshape(D, Hn, th)
    # Interleave per hidden tile: columns [h*2*th : h*2*th+th] are W1^T's tile h,
    # the next th columns are W3^T's tile h -> one contiguous BlockSpec slab.
    w13 = jnp.concatenate([w1_t, w3_t], axis=2).reshape(D, 2 * H_pad)
    w2_t = w2.T  # [H_pad, D]
    return w13, w2_t, th


def _ffn_kernel(x_ref, w13_ref, w2_ref, o_ref, acc_ref, *, th):
    # x_ref   : (TM, D)      token tile (native dtype, e.g. bf16)
    # w13_ref : (D, 2*th)    fused [W1^T | W3^T] slab for this hidden tile
    # w2_ref  : (th, D)      W2^T slab for this hidden tile
    # acc_ref : (TM, D) f32  resident accumulator across the hidden axis
    h = pl.program_id(1)

    @pl.when(h == 0)
    def _():
        acc_ref[...] = jnp.zeros_like(acc_ref)

    # Single fused MXU matmul for W1 and W3; f32 accumulation on the MXU.
    h13 = jnp.dot(x_ref[...], w13_ref[...], preferred_element_type=jnp.float32)
    h1 = h13[:, :th]
    h3 = h13[:, th:]

    # silu(h1) * h3 in f32 (VPU/EUP); cast back to the weight dtype for the MXU.
    gated = (h1 * jax.nn.sigmoid(h1)) * h3
    acc_ref[...] += jnp.dot(gated.astype(w2_ref.dtype), w2_ref[...],
                            preferred_element_type=jnp.float32)

    @pl.when(h == pl.num_programs(1) - 1)
    def _():
        o_ref[...] = acc_ref[...].astype(o_ref.dtype)


@functools.partial(jax.jit, static_argnames=("token_tile", "hidden_tile"))
def feed_forward(x, w13, w2_t, *, token_tile=256, hidden_tile=256):
    """x: [B, S, D]. w13/w2_t/hidden_tile come from prepare_weights()."""
    B, S, D = x.shape
    th = hidden_tile
    two_th = 2 * th
    H_pad = w2_t.shape[0]
    assert w13.shape == (D, 2 * H_pad)
    assert H_pad % th == 0
    Hn = H_pad // th

    T = B * S
    x2d = x.reshape(T, D)
    tm = min(token_tile, _round_up(T, 8))     # big tiles at real T, tiny demo ok
    T_pad = _round_up(T, tm)
    if T_pad != T:
        x2d = jnp.pad(x2d, ((0, T_pad - T), (0, 0)))   # zero rows -> zero output

    grid = (T_pad // tm, Hn)

    # VMEM budget: double-buffered x/weight/out tiles + f32 accumulator, 2x headroom.
    per_step_bytes = (tm * D * x2d.dtype.itemsize
                      + (D * two_th + th * D) * w13.dtype.itemsize
                      + tm * D * x.dtype.itemsize)
    est = 2 * per_step_bytes + tm * D * 4
    vmem_limit = int(min(64 * 1024 * 1024, max(2 * est, 32 * 1024 * 1024)))

    out2d = pl.pallas_call(
        functools.partial(_ffn_kernel, th=th),
        out_shape=jax.ShapeDtypeStruct((T_pad, D), x.dtype),
        grid_spec=pltpu.PrefetchScalarGridSpec(
            num_scalar_prefetch=0,
            grid=grid,
            in_specs=[
                pl.BlockSpec((tm, D), lambda t, h: (t, 0)),       # x token tile
                pl.BlockSpec((D, two_th), lambda t, h: (0, h)),   # [W1|W3] slab
                pl.BlockSpec((th, D), lambda t, h: (h, 0)),       # W2^T slab
            ],
            out_specs=pl.BlockSpec((tm, D), lambda t, h: (t, 0)),
            scratch_shapes=[pltpu.VMEM((tm, D), jnp.float32)],    # f32 accumulator
        ),
        compiler_params=pltpu.CompilerParams(
            dimension_semantics=("parallel", "arbitrary"),
            vmem_limit_bytes=vmem_limit,
        ),
    )(x2d, w13, w2_t)

    if T_pad != T:
        out2d = out2d[:T]
    return out2d.reshape(B, S, D)


def feed_forward_ref(x, w1, w2, w3):
    """Pure-JAX reference matching the PyTorch forward exactly."""
    h1 = jnp.einsum("bsd,hd->bsh", x, w1)
    h3 = jnp.einsum("bsd,hd->bsh", x, w3)
    gated = jax.nn.silu(h1) * h3
    return jnp.einsum("bsh,dh->bsd", gated, w2)


if __name__ == "__main__":
    # Module config (small but lane-dense: D and H are multiples of 128/256).
    dim = 256
    hidden_dim_arg = 768
    multiple_of = 256
    hidden = _round_hidden(hidden_dim_arg, multiple_of)   # -> 512

    batch, seq = 2, 8

    key = jax.random.PRNGKey(0)
    kx, k1, k2, k3 = jax.random.split(key, 4)

    x = jax.random.normal(kx, (batch, seq, dim), dtype=jnp.float32)
    # nn.Linear(in, out, bias=False) weight shape is [out, in].
    w1 = jax.random.normal(k1, (hidden, dim), dtype=jnp.float32) * 0.02
    w2 = jax.random.normal(k2, (dim, hidden), dtype=jnp.float32) * 0.02
    w3 = jax.random.normal(k3, (hidden, dim), dtype=jnp.float32) * 0.02

    ref = feed_forward_ref(x, w1, w2, w3)

    # float32 path (tight tolerance).
    w13, w2_t, th = prepare_weights(w1, w2, w3, hidden_tile=256)  # Hn=2 -> exercises accumulator
    out = feed_forward(x, w13, w2_t, token_tile=256, hidden_tile=th)
    out = jax.block_until_ready(out)
    assert out.shape == (batch, seq, dim)
    assert jnp.allclose(out, ref, atol=1e-4, rtol=1e-4), "f32 mismatch vs reference"

    # bf16 path (native MXU dtype; silu/gating and accumulation stay f32).
    xb = x.astype(jnp.bfloat16)
    w13b, w2tb, thb = prepare_weights(
        w1.astype(jnp.bfloat16), w2.astype(jnp.bfloat16), w3.astype(jnp.bfloat16),
        hidden_tile=256)
    outb = feed_forward(xb, w13b, w2tb, token_tile=256, hidden_tile=thb)
    outb = jax.block_until_ready(outb)
    assert jnp.allclose(outb.astype(jnp.float32), ref, atol=5e-2, rtol=5e-2), \
        "bf16 mismatch vs reference"

    print("KERNEL_OK")
</pallas_src>

<mosaic_0001>
module attributes {stable_mosaic.version = 11 : i64} {
  func.func @_ffn_kernel(%arg0: i32, %arg1: i32, %arg2: memref<16x256xf32, #tpu.memory_space<vmem>>, %arg3: memref<256x512xf32, #tpu.memory_space<vmem>>, %arg4: memref<256x256xf32, #tpu.memory_space<vmem>>, %arg5: memref<16x256xf32, #tpu.memory_space<vmem>>, %arg6: memref<16x256xf32, #tpu.memory_space<vmem>>) attributes {dimension_semantics = [#tpu.dimension_semantics<parallel>, #tpu.dimension_semantics<arbitrary>], iteration_bounds = array<i64: 1, 2>, scalar_prefetch = 0 : i64, scratch_operands = 1 : i64, tpu.core_type = #tpu.core_type<tc>, window_params = [{transform_indices = @transform_0, window_bounds = array<i64: 16, 256>}, {transform_indices = @transform_1, window_bounds = array<i64: 256, 512>}, {transform_indices = @transform_2, window_bounds = array<i64: 256, 256>}, {transform_indices = @transform_3, window_bounds = array<i64: 16, 256>}]} {
    %c0_i32 = arith.constant 0 : i32
    %0 = arith.cmpi eq, %arg1, %c0_i32 : i32
    %1 = arith.extui %0 : i1 to i32
    %c0_i32_0 = arith.constant 0 : i32
    %2 = arith.cmpi ne, %1, %c0_i32_0 : i32
    scf.if %2 {
      %cst_13 = arith.constant 0.000000e+00 : f32
      %23 = vector.broadcast %cst_13 : f32 to vector<16x256xf32>
      %c0_14 = arith.constant 0 : index
      %c0_15 = arith.constant 0 : index
      %24 = vector.load %arg6[%c0_14, %c0_15] : memref<16x256xf32, #tpu.memory_space<vmem>>, vector<16x256xf32>
      tpu.vector_store %arg6[%c0_14, %c0_15], %23 {strides = array<i32>} : memref<16x256xf32, #tpu.memory_space<vmem>>, vector<16x256xf32>,
    } else {
    }
    %c0 = arith.constant 0 : index
    %c0_1 = arith.constant 0 : index
    %3 = vector.load %arg2[%c0, %c0_1] : memref<16x256xf32, #tpu.memory_space<vmem>>, vector<16x256xf32>
    %c0_2 = arith.constant 0 : index
    %c0_3 = arith.constant 0 : index
    %4 = vector.load %arg3[%c0_2, %c0_3] : memref<256x512xf32, #tpu.memory_space<vmem>>, vector<256x512xf32>
    %cst = arith.constant dense<0.000000e+00> : vector<16x512xf32>
    %5 = tpu.matmul %3, %4, %cst {dimension_numbers = #tpu.dot_dimension_numbers<[1], [0], [0], [1], [0, 0, 1, 1], [], []>} : vector<16x256xf32>, vector<256x512xf32>, vector<16x512xf32> -> vector<16x512xf32>
    %6 = vector.extract_strided_slice %5 {offsets = [0, 0], sizes = [16, 256], strides = [1, 1]} : vector<16x512xf32> to vector<16x256xf32>
    %7 = vector.extract_strided_slice %5 {offsets = [0, 256], sizes = [16, 256], strides = [1, 1]} : vector<16x512xf32> to vector<16x256xf32>
    %8 = arith.negf %6 : vector<16x256xf32>
    %9 = math.exp %8 : vector<16x256xf32>
    %cst_4 = arith.constant 1.000000e+00 : f32
    %10 = vector.broadcast %cst_4 : f32 to vector<16x256xf32>
    %11 = arith.addf %10, %9 : vector<16x256xf32>
    %12 = arith.divf %10, %11 : vector<16x256xf32>
    %13 = arith.mulf %6, %12 : vector<16x256xf32>
    %14 = arith.mulf %13, %7 : vector<16x256xf32>
    %c0_5 = arith.constant 0 : index
    %c0_6 = arith.constant 0 : index
    %15 = vector.load %arg6[%c0_5, %c0_6] : memref<16x256xf32, #tpu.memory_space<vmem>>, vector<16x256xf32>
    %c0_7 = arith.constant 0 : index
    %c0_8 = arith.constant 0 : index
    %16 = vector.load %arg4[%c0_7, %c0_8] : memref<256x256xf32, #tpu.memory_space<vmem>>, vector<256x256xf32>
    %cst_9 = arith.constant dense<0.000000e+00> : vector<16x256xf32>
    %17 = tpu.matmul %14, %16, %cst_9 {dimension_numbers = #tpu.dot_dimension_numbers<[1], [0], [0], [1], [0, 0, 1, 1], [], []>} : vector<16x256xf32>, vector<256x256xf32>, vector<16x256xf32> -> vector<16x256xf32>
    %18 = arith.addf %15, %17 : vector<16x256xf32>
    %c0_10 = arith.constant 0 : index
    %c0_11 = arith.constant 0 : index
    %19 = vector.load %arg6[%c0_10, %c0_11] : memref<16x256xf32, #tpu.memory_space<vmem>>, vector<16x256xf32>
    tpu.vector_store %arg6[%c0_10, %c0_11], %18 {strides = array<i32>} : memref<16x256xf32, #tpu.memory_space<vmem>>, vector<16x256xf32>,
    %c1_i32 = arith.constant 1 : i32
    %20 = arith.cmpi eq, %arg1, %c1_i32 : i32
    %21 = arith.extui %20 : i1 to i32
    %c0_i32_12 = arith.constant 0 : i32
    %22 = arith.cmpi ne, %21, %c0_i32_12 : i32
    scf.if %22 {
      %c0_13 = arith.constant 0 : index
      %c0_14 = arith.constant 0 : index
      %23 = vector.load %arg6[%c0_13, %c0_14] : memref<16x256xf32, #tpu.memory_space<vmem>>, vector<16x256xf32>
      %c0_15 = arith.constant 0 : index
      %c0_16 = arith.constant 0 : index
      %24 = vector.load %arg5[%c0_15, %c0_16] : memref<16x256xf32, #tpu.memory_space<vmem>>, vector<16x256xf32>
      tpu.vector_store %arg5[%c0_15, %c0_16], %23 {strides = array<i32>} : memref<16x256xf32, #tpu.memory_space<vmem>>, vector<16x256xf32>,
    } else {
    }
    return
  }
  func.func @transform_0(%arg0: i32, %arg1: i32) -> (i32, i32) {
    %c0_i32 = arith.constant 0 : i32
    %c0_i32_0 = arith.constant 0 : i32
    return %arg0, %c0_i32 : i32, i32
  }
  func.func @transform_1(%arg0: i32, %arg1: i32) -> (i32, i32) {
    %c0_i32 = arith.constant 0 : i32
    %c0_i32_0 = arith.constant 0 : i32
    return %c0_i32, %arg1 : i32, i32
  }
  func.func @transform_2(%arg0: i32, %arg1: i32) -> (i32, i32) {
    %c0_i32 = arith.constant 0 : i32
    %c0_i32_0 = arith.constant 0 : i32
    return %arg1, %c0_i32 : i32, i32
  }
  func.func @transform_3(%arg0: i32, %arg1: i32) -> (i32, i32) {
    %c0_i32 = arith.constant 0 : i32
    %c0_i32_0 = arith.constant 0 : i32
    return %arg0, %c0_i32 : i32, i32
  }
}

</mosaic_0001>

<bundles_post_ra>
// kernel: feed_forward.1
= control target key start
LH: loop header
LB: loop body
LE: loop exit
PB: predicated region body
PF: predicated region fallthrough
CT: control target
= control target key end

     0   :  { %8 = vsyncpa [#allocation4], 0  ;;  %s1614_s0 = inlined_call_operand.hbm [shape: f32[16,256], index: 0, kind: input, shape index: {}]   ;;  %s1615_s1 = inlined_call_operand.hbm [shape: f32[256,1024], index: 1, kind: input, shape index: {}]   ;;  %s1616_s2 = inlined_call_operand.hbm [shape: f32[512,256], index: 2, kind: input, shape index: {}]   ;;  %s1617_s3 = inlined_call_operand.hbm [shape: f32[16,256], index: 3, kind: output, shape index: {}]  }
   0x1   :  { %9 = vsyncpa [#allocation7], 0 }
   0x2   :  { %11 = vsyncpa [#allocation7 + $0x1], 0 }
   0x3   :  { %12 = vsyncpa [#allocation5], 0  ;;  %s1251_s12 = smov 0   ;;  %s1253_s13 = smov 0  }
   0x4   :  { %s1255_s14 = smov 0   ;;  %s1257_s15 = smov 0  }
   0x5   :  { %s1259_s16 = smov 0   ;;  %s1261_s17 = smov 0  }
   0x6 LB: > { %s27_s18 = sadd.s32 1, %s1213_s16  ;;  %s63_s19 = sadd.s32 1, %s1205_s14  ;;  %s1217_s17 = sphi %s1261_s17, %s18_s17   ;;  %s1213_s16 = sphi %s1259_s16, %s1626_s16   ;;  %s1209_s15 = sphi %s1257_s15, %s1625_s15   ;;  %s1205_s14 = sphi %s1255_s14, %s1624_s14   ;;  %s1201_s13 = sphi %s1253_s13, %s1623_s13   ;;  %s1197_s12 = sphi %s1251_s12, %s1622_s12  }
   0x7   : > { %p28_p0 = scmp.ge.s32.totalorder %s27_s18, 2  ;;  %p70_p1 = scmp.ne.s32.totalorder %s1205_s14, %s1201_s13 }
   0x8   : > { %p71_p2 = scmp.eq.s32.totalorder %s1217_s17, 0  ;;  %p975_p4 = scmp.lt.s32.totalorder %s1217_s17, 2 }
   0x9   : > { %s1628_s18 = smov (%p28_p0, %s27_s18), 0  ;;  %s169_s21 = sand.u32 1, %s1217_s17  }
   0xa   : > { %p72_p3 = por %p71_p2, %p70_p1  ;;  %s60_s20 = ssub.s32 %s1213_s16, %s1628_s18 }
   0xb   : > { %p61_p5 = scmp.eq.s32.totalorder %s60_s20, 0  ;;  %s171_s22 = sand.u32 1, %s1205_s14  }
   0xc   : > { %s884_s23 = sshll.u32 %s1213_s16, 9  ;;  %s863_s25 = sshll.u32 %s171_s22, 10 }
   0xd   : > { %s1295_s24 = scalar_select %p61_p5, %s1205_s14, %s63_s19  }
   0xe   : > { %s179_s28 = scalar_lea.hbm %s1615_s1, %s884_s23  ;;  %p1302_p6 = pnand %p975_p4, %p72_p3 }
   0xf   : > { %s173_s30 = scalar_lea.vmem [#allocation6], %s863_s25  ;;  %s1306_s5 = scalar_lea.sflag [#allocation7], %s169_s21 }
  0x10   : > { %s180_s4 = sshll.u32 %s173_s30, 4  ;;  %p1055_p7 = pneg %p1302_p6  ;;  %s181_s4 = int_to_ptr.vmem [resolvable:$true] %s180_s4 }
  0x11   : > { %s1066_s6 = scalar_lea.vmem %s181_s4, 16384  ;;  %s1219_s7 = smov [#allocation6]  }
  0x12   : > { %p1067_p8 = scmp.ne.s32.totalorder %s181_s4, %s1066_s6  ;;  %s1071_s8 = sshll.u32 %s1219_s7, 4  ;;  %s1072_s8 = int_to_ptr.vmem [resolvable:$false] %s1071_s8 }
  0x13   : > { %s1073_s9 = scalar_lea.vmem %s1072_s8, 32768  ;;  %p1074_p11 = scmp.lt.s32.totalorder %s181_s4, %s1072_s8 }
  0x14   : > { %p1069_p9 = pnand %p1067_p8, %p1055_p7  ;;  %p1075_p12 = scmp.lt.s32.totalorder %s1073_s9, %s1066_s6 }
  0x16   : > { %p1070_p10 = pneg %p1069_p9  ;;  %p1076_p13 = por %p1075_p12, %p1074_p11 }
  0x18   : > { %p1077_p0 = pnand %p1076_p13, %p1070_p10 }
  0x1a   : > { %1080 = shalt.err (!%p1077_p0)
}
  0x1b   : > { %s1220_s10 = smov 1024   ;;  %s1221_s11 = smov 512  }
  0x1c   : > { %s1222_s19 = smov 32   ;;  %s1317_s20 = sadd.s32 4294967295, %s1217_s17  }
  0x1d   : > { %970 = dma.hbm_to_vmem [thread:$0]  (!%p1302_p6), %s179_s28, 16384, %s181_s4, %s1306_s5, %s1220_s10, %s1221_s11, %s1222_s19  }
  0x1e   : > { %p76_p1 = scmp.ne.s32.totalorder %s1201_s13, %s1197_s12  ;;  %p77_p2 = scmp.eq.s32.totalorder %s1317_s20, 0 }
  0x1f   : > { %p860_p3 = scmp.ge.s32.totalorder %s1217_s17, 1  ;;  %p139_p4 = scmp.lt.s32.totalorder %s1217_s17, 3 }
  0x20   : > { %p1326_p5 = por %p77_p2, %p76_p1  ;;  %s1223_s25 = smov [#allocation3]  }
  0x21   : > { %p1330_p8 = pnand %p860_p3, %p139_p4  ;;  %s155_s26 = sshll.u32 %s1223_s25, 4  ;;  %s156_s26 = int_to_ptr.vmem [resolvable:$true] %s155_s26 }
  0x22   : > { %s866_s12 = sshll.u32 %s171_s22, 9  ;;  %s886_s27 = sshll.u32 %s1213_s16, 13 }
  0x23   : > { %p963_p9 = pneg %p1330_p8  ;;  %s1348_s6 = scalar_lea.hbm %s1616_s2, %s886_s27 }
  0x24   : > { %s194_s7 = scalar_lea.vmem [#allocation8], %s866_s12  ;;  %s1092_s9 = scalar_lea.vmem %s156_s26, 512 }
  0x25   : > { %p1341_p10 = pnand %p963_p9, %p77_p2  ;;  %s202_s8 = sshll.u32 %s194_s7, 4  ;;  %s1350_s8 = int_to_ptr.vmem [resolvable:$true] %s202_s8 }
  0x26   : > { %p1093_p12 = scmp.ne.s32.totalorder %s156_s26, %s1092_s9  ;;  %p1100_p1 = scmp.lt.s32.totalorder %s156_s26, %s156_s26 }
  0x27   : > { %p1083_p11 = pneg %p1341_p10  ;;  %p1101_p3 = scmp.lt.s32.totalorder %s1092_s9, %s1092_s9 }
  0x29   : > { %p1095_p13 = pnand %p1093_p12, %p1083_p11  ;;  %p1102_p4 = por %p1101_p3, %p1100_p1 }
  0x2b   : > { %p1096_p0 = pneg %p1095_p13 }
  0x2d   : > { %p1103_p9 = pnand %p1102_p4, %p1096_p0 }
  0x2f   : > { %1106 = shalt.err (!%p1103_p9)
}
  0x30   : > { %s1224_s22 = smov 256   ;;  %s1225_s10 = smov 16  }
  0x31   : > { %966 = dma.hbm_to_vmem [thread:$0]  (!%p1341_p10), %s1614_s0, 512, %s156_s26, [#allocation4], %s1224_s22, %s1224_s22, %s1225_s10  }
  0x32   : > { %s1120_s25 = scalar_lea.vmem %s1350_s8, 8192  ;;  %s1226_s12 = smov [#allocation8]  }
  0x33   : > { %p1121_p11 = scmp.ne.s32.totalorder %s1350_s8, %s1120_s25  ;;  %s1125_s27 = sshll.u32 %s1226_s12, 4  ;;  %s1126_s27 = int_to_ptr.vmem [resolvable:$false] %s1125_s27 }
  0x34   : > { %s1127_s30 = scalar_lea.vmem %s1126_s27, 16384  ;;  %p1128_p0 = scmp.lt.s32.totalorder %s1350_s8, %s1126_s27 }
  0x35   : > { %p1123_p12 = pnand %p1121_p11, %p1055_p7  ;;  %p1129_p1 = scmp.lt.s32.totalorder %s1127_s30, %s1120_s25 }
  0x37   : > { %p1124_p13 = pneg %p1123_p12  ;;  %p1130_p3 = por %p1129_p1, %p1128_p0 }
  0x39   : > { %p1131_p4 = pnand %p1130_p3, %p1124_p13 }
  0x3b   : > { %1134 = shalt.err (!%p1131_p4)
}
  0x3c   : > { %973 = dma.hbm_to_vmem [thread:$0]  (!%p1302_p6), %s1348_s6, 8192, %s1350_s8, %s1306_s5, %s1224_s22, %s1224_s22, %s1225_s10  }
  0x3d   : > { %214 = sbr.rel (%p1330_p8) target bundleno = 604 (0x25c), region = 32 }
  0x42   : > { %1184 = dma.done.wait (%p77_p2), [#allocation4], 512  }
  0x43   : > { %1186 = vsyncadd (%p77_p2), [#allocation4], 4294966784  ;;  %s220_s26 = sand.u32 1, %s1317_s20   ;;  %s222_s28 = sand.u32 1, %s1201_s13  }
  0x44   : > { %s872_s4 = sshll.u32 %s222_s28, 10  ;;  %s221_s29 = scalar_lea.sflag [#allocation7], %s220_s26 }
  0x45   : > { %s1378_s7 = scalar_lea.vmem [#allocation6], %s872_s4 }
  0x46   : > { %1188 = dma.done.wait (%p1326_p5), %s221_s29, 24576  }
  0x47   : > { %1190 = vsyncadd (%p1326_p5), %s221_s29, 4294942720  ;;  %s873_s5 = sshll.u32 %s222_s28, 9  ;;  %p874_p6 = scmp.ne.s32.totalorder %s1209_s15, 0 }
  0x48   : > { %s1384_s23 = scalar_lea.vmem [#allocation8], %s873_s5 }
  0x49   : > { %263 = sbr.rel (%p874_p6) target bundleno = 81 (0x51), region = 48 }
  0x4e   : > { %v1227_v0 = vmov 0.0  }
  0x4f   : > { %264 = vst [vmem:[#allocation2 + $0x10] sm:$0xff] %v1227_v0  ;;  %265 = vst [vmem:[#allocation2] sm:$0xff] %v1227_v0 }
  0x50   : > { %266 = vst [vmem:[#allocation2 + $0x18] sm:$0xff] %v1227_v0  ;;  %267 = vst [vmem:[#allocation2 + $0x8] sm:$0xff] %v1227_v0 }
  0x51 PF: > { %v333_v1 = vld [vmem:[%s1378_s7 + $0x1e8] sm:$0xff]  ;;  %v332_v2 = vld [vmem:[%s1378_s7 + $0x1e0] sm:$0xff]  ;;  %v335_v15 = vld [vmem:[%s1378_s7 + $0x1f8] sm:$0xff]  ;;  %p879_p7 = scmp.ne.s32.totalorder %s1209_s15, 1 }
  0x52   : > { %v329_v3 = vld [vmem:[%s1378_s7 + $0x1c8] sm:$0xff]  ;;  %400 = vmatprep.subr.mxu0 %v333_v1  ;;  %v328_v4 = vld [vmem:[%s1378_s7 + $0x1c0] sm:$0xff]  ;;  %v334_v16 = vld [vmem:[%s1378_s7 + $0x1f0] sm:$0xff]  ;;  %477 = vmatprep.subr.mxu1 %v335_v15 }
  0x53   : > { %401 = vmatpush1.msra.mxu0 %v332_v2  ;;  %v325_v5 = vld [vmem:[%s1378_s7 + $0x1a8] sm:$0xff]  ;;  %v324_v6 = vld [vmem:[%s1378_s7 + $0x1a0] sm:$0xff]  ;;  %v331_v18 = vld [vmem:[%s1378_s7 + $0x1d8] sm:$0xff]  ;;  %478 = vmatpush1.msra.mxu1 %v334_v16 }
  0x54   : > { %402 = vmatprep.subr.mxu0 %v329_v3  ;;  %v321_v7 = vld [vmem:[%s1378_s7 + $0x188] sm:$0xff]  ;;  %v320_v8 = vld [vmem:[%s1378_s7 + $0x180] sm:$0xff]  ;;  %v330_v20 = vld [vmem:[%s1378_s7 + $0x1d0] sm:$0xff]  ;;  %479 = vmatprep.subr.mxu1 %v331_v18 }
  0x55   : > { %403 = vmatpush1.msra.mxu0 %v328_v4  ;;  %v317_v9 = vld [vmem:[%s1378_s7 + $0x168] sm:$0xff]  ;;  %v316_v10 = vld [vmem:[%s1378_s7 + $0x160] sm:$0xff]  ;;  %v327_v21 = vld [vmem:[%s1378_s7 + $0x1b8] sm:$0xff]  ;;  %480 = vmatpush1.msra.mxu1 %v330_v20 }
  0x56   : > { %404 = vmatprep.subr.mxu0 %v325_v5  ;;  %v313_v11 = vld [vmem:[%s1378_s7 + $0x148] sm:$0xff]  ;;  %v312_v12 = vld [vmem:[%s1378_s7 + $0x140] sm:$0xff]  ;;  %v326_v23 = vld [vmem:[%s1378_s7 + $0x1b0] sm:$0xff]  ;;  %481 = vmatprep.subr.mxu1 %v327_v21 }
  0x57   : > { %405 = vmatpush1.msra.mxu0 %v324_v6  ;;  %v309_v13 = vld [vmem:[%s1378_s7 + $0x128] sm:$0xff]  ;;  %v308_v14 = vld [vmem:[%s1378_s7 + $0x120] sm:$0xff]  ;;  %v323_v25 = vld [vmem:[%s1378_s7 + $0x198] sm:$0xff]  ;;  %482 = vmatpush1.msra.mxu1 %v326_v23 }
  0x58   : > { %406 = vmatprep.subr.mxu0 %v321_v7  ;;  %v305_v17 = vld [vmem:[%s1378_s7 + $0x108] sm:$0xff]  ;;  %v304_v19 = vld [vmem:[%s1378_s7 + $0x100] sm:$0xff]  ;;  %v322_v27 = vld [vmem:[%s1378_s7 + $0x190] sm:$0xff]  ;;  %483 = vmatprep.subr.mxu1 %v323_v25 }
  0x59   : > { %407 = vmatpush1.msra.mxu0 %v320_v8  ;;  %v301_v22 = vld [vmem:[%s1378_s7 + $0xe8] sm:$0xff]  ;;  %v300_v24 = vld [vmem:[%s1378_s7 + $0xe0] sm:$0xff]  ;;  %v319_v29 = vld [vmem:[%s1378_s7 + $0x178] sm:$0xff]  ;;  %484 = vmatpush1.msra.mxu1 %v322_v27 }
  0x5a   : > { %408 = vmatprep.subr.mxu0 %v317_v9  ;;  %v297_v26 = vld [vmem:[%s1378_s7 + $0xc8] sm:$0xff]  ;;  %v296_v28 = vld [vmem:[%s1378_s7 + $0xc0] sm:$0xff]  ;;  %v318_v31 = vld [vmem:[%s1378_s7 + $0x170] sm:$0xff]  ;;  %485 = vmatprep.subr.mxu1 %v319_v29 }
  0x5b   : > { %409 = vmatpush1.msra.mxu0 %v316_v10  ;;  %v293_v30 = vld [vmem:[%s1378_s7 + $0xa8] sm:$0xff]  ;;  %v292_v32 = vld [vmem:[%s1378_s7 + $0xa0] sm:$0xff]  ;;  %v315_v33 = vld [vmem:[%s1378_s7 + $0x158] sm:$0xff]  ;;  %486 = vmatpush1.msra.mxu1 %v318_v31 }
  0x5c   : > { %410 = vmatprep.subr.mxu0 %v313_v11  ;;  %v289_v34 = vld [vmem:[%s1378_s7 + $0x88] sm:$0xff]  ;;  %v314_v35 = vld [vmem:[%s1378_s7 + $0x150] sm:$0xff]  ;;  %v288_v36 = vld [vmem:[%s1378_s7 + $0x80] sm:$0xff]  ;;  %487 = vmatprep.subr.mxu1 %v315_v33 }
  0x5d   : > { %411 = vmatpush1.msra.mxu0 %v312_v12  ;;  %v311_v37 = vld [vmem:[%s1378_s7 + $0x138] sm:$0xff]  ;;  %v285_v38 = vld [vmem:[%s1378_s7 + $0x68] sm:$0xff]  ;;  %v310_v39 = vld [vmem:[%s1378_s7 + $0x130] sm:$0xff]  ;;  %488 = vmatpush1.msra.mxu1 %v314_v35 }
  0x5e   : > { %412 = vmatprep.subr.mxu0 %v309_v13  ;;  %v284_v40 = vld [vmem:[%s1378_s7 + $0x60] sm:$0xff]  ;;  %v307_v41 = vld [vmem:[%s1378_s7 + $0x118] sm:$0xff]  ;;  %v281_v42 = vld [vmem:[%s1378_s7 + $0x48] sm:$0xff]  ;;  %489 = vmatprep.subr.mxu1 %v311_v37 }
  0x5f   : > { %413 = vmatpush1.msra.mxu0 %v308_v14  ;;  %v306_v43 = vld [vmem:[%s1378_s7 + $0x110] sm:$0xff]  ;;  %v280_v44 = vld [vmem:[%s1378_s7 + $0x40] sm:$0xff]  ;;  %490 = vmatpush1.msra.mxu1 %v310_v39  ;;  %v303_v45 = vld [vmem:[%s1378_s7 + $0xf8] sm:$0xff] }
  0x60   : > { %414 = vmatprep.subr.mxu0 %v305_v17  ;;  %v277_v46 = vld [vmem:[%s1378_s7 + $0x28] sm:$0xff]  ;;  %491 = vmatprep.subr.mxu1 %v307_v41  ;;  %v302_v47 = vld [vmem:[%s1378_s7 + $0xf0] sm:$0xff]  ;;  %v276_v48 = vld [vmem:[%s1378_s7 + $0x20] sm:$0xff] }
  0x61   : > { %415 = vmatpush1.msra.mxu0 %v304_v19  ;;  %492 = vmatpush1.msra.mxu1 %v306_v43  ;;  %v299_v49 = vld [vmem:[%s1378_s7 + $0xd8] sm:$0xff]  ;;  %v273_v50 = vld [vmem:[%s1378_s7 + $0x8] sm:$0xff]  ;;  %v298_v51 = vld [vmem:[%s1378_s7 + $0xd0] sm:$0xff] }
  0x62   : > { %416 = vmatprep.subr.mxu0 %v301_v22  ;;  %493 = vmatprep.subr.mxu1 %v303_v45  ;;  %v272_v52 = vld [vmem:[%s1378_s7] sm:$0xff]  ;;  %v295_v53 = vld [vmem:[%s1378_s7 + $0xb8] sm:$0xff]  ;;  %v397_v54 = vld [vmem:[%s1378_s7 + $0x3e8] sm:$0xff] }
  0x63   : > { %417 = vmatpush1.msra.mxu0 %v300_v24  ;;  %494 = vmatpush1.msra.mxu1 %v302_v47  ;;  %v294_v55 = vld [vmem:[%s1378_s7 + $0xb0] sm:$0xff]  ;;  %v396_v56 = vld [vmem:[%s1378_s7 + $0x3e0] sm:$0xff]  ;;  %v291_v57 = vld [vmem:[%s1378_s7 + $0x98] sm:$0xff] }
  0x64   : > { %418 = vmatprep.subr.mxu0 %v297_v26  ;;  %495 = vmatprep.subr.mxu1 %v299_v49  ;;  %v393_v58 = vld [vmem:[%s1378_s7 + $0x3c8] sm:$0xff]  ;;  %v290_v59 = vld [vmem:[%s1378_s7 + $0x90] sm:$0xff]  ;;  %v392_v60 = vld [vmem:[%s1378_s7 + $0x3c0] sm:$0xff] }
  0x65   : > { %419 = vmatpush1.msra.mxu0 %v296_v28  ;;  %496 = vmatpush1.msra.mxu1 %v298_v51  ;;  %v287_v61 = vld [vmem:[%s1378_s7 + $0x78] sm:$0xff]  ;;  %v389_v62 = vld [vmem:[%s1378_s7 + $0x3a8] sm:$0xff]  ;;  %v286_v63 = vld [vmem:[%s1378_s7 + $0x70] sm:$0xff] }
  0x66   : > { %420 = vmatprep.subr.mxu0 %v293_v30  ;;  %497 = vmatprep.subr.mxu1 %v295_v53  ;;  %v388_v0 = vld [vmem:[%s1378_s7 + $0x3a0] sm:$0xff]  ;;  %v283_v1 = vld [vmem:[%s1378_s7 + $0x58] sm:$0xff]  ;;  %v385_v2 = vld [vmem:[%s1378_s7 + $0x388] sm:$0xff] }
  0x67   : > { %421 = vmatpush1.msra.mxu0 %v292_v32  ;;  %498 = vmatpush1.msra.mxu1 %v294_v55  ;;  %v282_v3 = vld [vmem:[%s1378_s7 + $0x50] sm:$0xff]  ;;  %v384_v4 = vld [vmem:[%s1378_s7 + $0x380] sm:$0xff]  ;;  %v279_v5 = vld [vmem:[%s1378_s7 + $0x38] sm:$0xff] }
  0x68   : > { %422 = vmatprep.subr.mxu0 %v289_v34  ;;  %499 = vmatprep.subr.mxu1 %v291_v57  ;;  %v381_v6 = vld [vmem:[%s1378_s7 + $0x368] sm:$0xff]  ;;  %v278_v7 = vld [vmem:[%s1378_s7 + $0x30] sm:$0xff]  ;;  %v380_v8 = vld [vmem:[%s1378_s7 + $0x360] sm:$0xff] }
  0x69   : > { %423 = vmatpush1.msra.mxu0 %v288_v36  ;;  %500 = vmatpush1.msra.mxu1 %v290_v59  ;;  %v275_v9 = vld [vmem:[%s1378_s7 + $0x18] sm:$0xff]  ;;  %v377_v10 = vld [vmem:[%s1378_s7 + $0x348] sm:$0xff]  ;;  %v376_v12 = vld [vmem:[%s1378_s7 + $0x340] sm:$0xff] }
  0x6a   : > { %424 = vmatprep.subr.mxu0 %v285_v38  ;;  %501 = vmatprep.subr.mxu1 %v287_v61  ;;  %v1461_v11 = vld [vmem:[#allocation3 + $0x8] sm:$0xff]  ;;  %v274_v13 = vld [vmem:[%s1378_s7 + $0x10] sm:$0xff]  ;;  %v399_v15 = vld [vmem:[%s1378_s7 + $0x3f8] sm:$0xff] }
  0x6b   : > { %425 = vmatpush1.msra.mxu0 %v284_v40  ;;  %502 = vmatpush1.msra.mxu1 %v286_v63  ;;  %v373_v14 = vld [vmem:[%s1378_s7 + $0x328] sm:$0xff]  ;;  %v372_v16 = vld [vmem:[%s1378_s7 + $0x320] sm:$0xff]  ;;  %v398_v17 = vld [vmem:[%s1378_s7 + $0x3f0] sm:$0xff] }
  0x6c   : > { %426 = vmatprep.subr.mxu0 %v281_v42  ;;  %503 = vmatprep.subr.mxu1 %v283_v1  ;;  %v369_v18 = vld [vmem:[%s1378_s7 + $0x308] sm:$0xff]  ;;  %v395_v19 = vld [vmem:[%s1378_s7 + $0x3d8] sm:$0xff]  ;;  %v368_v20 = vld [vmem:[%s1378_s7 + $0x300] sm:$0xff] }
  0x6d   : > { %427 = vmatpush1.msra.mxu0 %v280_v44  ;;  %504 = vmatpush1.msra.mxu1 %v282_v3  ;;  %v394_v21 = vld [vmem:[%s1378_s7 + $0x3d0] sm:$0xff]  ;;  %v365_v22 = vld [vmem:[%s1378_s7 + $0x2e8] sm:$0xff]  ;;  %v391_v23 = vld [vmem:[%s1378_s7 + $0x3b8] sm:$0xff] }
  0x6e   : > { %428 = vmatprep.subr.mxu0 %v277_v46  ;;  %505 = vmatprep.subr.mxu1 %v279_v5  ;;  %v364_v24 = vld [vmem:[%s1378_s7 + $0x2e0] sm:$0xff]  ;;  %v390_v25 = vld [vmem:[%s1378_s7 + $0x3b0] sm:$0xff]  ;;  %v361_v26 = vld [vmem:[%s1378_s7 + $0x2c8] sm:$0xff] }
  0x6f   : > { %429 = vmatpush1.msra.mxu0 %v276_v48  ;;  %506 = vmatpush1.msra.mxu1 %v278_v7  ;;  %v387_v27 = vld [vmem:[%s1378_s7 + $0x398] sm:$0xff]  ;;  %v360_v28 = vld [vmem:[%s1378_s7 + $0x2c0] sm:$0xff]  ;;  %v386_v29 = vld [vmem:[%s1378_s7 + $0x390] sm:$0xff] }
  0x70   : > { %430 = vmatprep.subr.mxu0 %v273_v50  ;;  %507 = vmatprep.subr.mxu1 %v275_v9  ;;  %v357_v30 = vld [vmem:[%s1378_s7 + $0x2a8] sm:$0xff]  ;;  %v383_v31 = vld [vmem:[%s1378_s7 + $0x378] sm:$0xff]  ;;  %v356_v32 = vld [vmem:[%s1378_s7 + $0x2a0] sm:$0xff] }
  0x71   : > { %431 = vmatpush1.msra.mxu0 %v272_v52  ;;  %464 = vmatprep.mubr.f32.mxu0 %v1461_v11  ;;  %v382_v33 = vld [vmem:[%s1378_s7 + $0x370] sm:$0xff]  ;;  %v353_v34 = vld [vmem:[%s1378_s7 + $0x288] sm:$0xff]  ;;  %v379_v35 = vld [vmem:[%s1378_s7 + $0x358] sm:$0xff] }
  0x72   : > { %432 = vmatprep.subr.mxu0 %v397_v54  ;;  %508 = vmatpush1.msra.mxu1 %v274_v13  ;;  %v352_v36 = vld [vmem:[%s1378_s7 + $0x280] sm:$0xff]  ;;  %v378_v37 = vld [vmem:[%s1378_s7 + $0x350] sm:$0xff]  ;;  %v349_v38 = vld [vmem:[%s1378_s7 + $0x268] sm:$0xff] }
  0x73   : > { %433 = vmatpush2.msra.mxu0 %v396_v56  ;;  %509 = vmatprep.subr.mxu1 %v399_v15  ;;  %v375_v39 = vld [vmem:[%s1378_s7 + $0x338] sm:$0xff]  ;;  %v348_v40 = vld [vmem:[%s1378_s7 + $0x260] sm:$0xff]  ;;  %v374_v41 = vld [vmem:[%s1378_s7 + $0x330] sm:$0xff] }
  0x74   : > { %434 = vmatprep.subr.mxu0 %v393_v58  ;;  %510 = vmatpush2.msra.mxu1 %v398_v17  ;;  %v345_v42 = vld [vmem:[%s1378_s7 + $0x248] sm:$0xff]  ;;  %v371_v43 = vld [vmem:[%s1378_s7 + $0x318] sm:$0xff]  ;;  %v344_v44 = vld [vmem:[%s1378_s7 + $0x240] sm:$0xff] }
  0x75   : > { %435 = vmatpush2.msra.mxu0 %v392_v60  ;;  %511 = vmatprep.subr.mxu1 %v395_v19  ;;  %v370_v45 = vld [vmem:[%s1378_s7 + $0x310] sm:$0xff]  ;;  %v341_v46 = vld [vmem:[%s1378_s7 + $0x228] sm:$0xff]  ;;  %v367_v47 = vld [vmem:[%s1378_s7 + $0x2f8] sm:$0xff] }
  0x76   : > { %436 = vmatprep.subr.mxu0 %v389_v62  ;;  %512 = vmatpush2.msra.mxu1 %v394_v21  ;;  %v340_v48 = vld [vmem:[%s1378_s7 + $0x220] sm:$0xff]  ;;  %v366_v49 = vld [vmem:[%s1378_s7 + $0x2f0] sm:$0xff]  ;;  %v337_v50 = vld [vmem:[%s1378_s7 + $0x208] sm:$0xff] }
  0x77   : > { %437 = vmatpush2.msra.mxu0 %v388_v0  ;;  %513 = vmatprep.subr.mxu1 %v391_v23  ;;  %v363_v51 = vld [vmem:[%s1378_s7 + $0x2d8] sm:$0xff]  ;;  %v336_v52 = vld [vmem:[%s1378_s7 + $0x200] sm:$0xff]  ;;  %v362_v53 = vld [vmem:[%s1378_s7 + $0x2d0] sm:$0xff] }
  0x78   : > { %438 = vmatprep.subr.mxu0 %v385_v2  ;;  %514 = vmatpush2.msra.mxu1 %v390_v25  ;;  %v268_v54 = vld [vmem:[#allocation3] sm:$0xff]  ;;  %v359_v55 = vld [vmem:[%s1378_s7 + $0x2b8] sm:$0xff]  ;;  %v358_v57 = vld [vmem:[%s1378_s7 + $0x2b0] sm:$0xff] }
  0x79   : > { %439 = vmatpush2.msra.mxu0 %v384_v4  ;;  %515 = vmatprep.subr.mxu1 %v387_v27  ;;  %v271_v56 = vld [vmem:[#allocation3 + $0x18] sm:$0xff]  ;;  %v354_v59 = vld [vmem:[%s1378_s7 + $0x290] sm:$0xff]  ;;  %v619_v2 = vld [vmem:[%s1384_s23 + $0xe8] sm:$0xff] }
  0x7a   : > { %440 = vmatprep.subr.mxu0 %v381_v6  ;;  %516 = vmatpush2.msra.mxu1 %v386_v29  ;;  %v355_v58 = vld [vmem:[%s1378_s7 + $0x298] sm:$0xff]  ;;  %v270_v61 = vld [vmem:[#allocation3 + $0x10] sm:$0xff]  ;;  %v618_v4 = vld [vmem:[%s1384_s23 + $0xe0] sm:$0xff] }
  0x7b   : > { %441 = vmatpush2.msra.mxu0 %v380_v8  ;;  %517 = vmatprep.subr.mxu1 %v383_v31  ;;  %v621_v60 = vld [vmem:[%s1384_s23 + $0xf8] sm:$0xff]  ;;  %v350_v63 = vld [vmem:[%s1378_s7 + $0x270] sm:$0xff]  ;;  %v611_v15 = vld [vmem:[%s1384_s23 + $0xa8] sm:$0xff] }
  0x7c   : > { %442 = vmatprep.subr.mxu0 %v377_v10  ;;  %518 = vmatpush2.msra.mxu1 %v382_v33  ;;  %v351_v62 = vld [vmem:[%s1378_s7 + $0x278] sm:$0xff]  ;;  %v620_v0 = vld [vmem:[%s1384_s23 + $0xf0] sm:$0xff]  ;;  %v615_v10 = vld [vmem:[%s1384_s23 + $0xc8] sm:$0xff] }
  0x7d   : > { %443 = vmatpush2.msra.mxu0 %v376_v12  ;;  %519 = vmatprep.subr.mxu1 %v379_v35  ;;  %v347_v1 = vld [vmem:[%s1378_s7 + $0x258] sm:$0xff]  ;;  %v346_v3 = vld [vmem:[%s1378_s7 + $0x250] sm:$0xff]  ;;  %v614_v12 = vld [vmem:[%s1384_s23 + $0xc0] sm:$0xff] }
  0x7e   : > { %444 = vmatprep.subr.mxu0 %v373_v14  ;;  %520 = vmatpush2.msra.mxu1 %v378_v37  ;;  %v343_v5 = vld [vmem:[%s1378_s7 + $0x238] sm:$0xff]  ;;  %v342_v7 = vld [vmem:[%s1378_s7 + $0x230] sm:$0xff]  ;;  %v607_v19 = vld [vmem:[%s1384_s23 + $0x88] sm:$0xff] }
  0x7f   : > { %445 = vmatpush2.msra.mxu0 %v372_v16  ;;  %521 = vmatprep.subr.mxu1 %v375_v39  ;;  %v617_v6 = vld [vmem:[%s1384_s23 + $0xd8] sm:$0xff]  ;;  %v616_v8 = vld [vmem:[%s1384_s23 + $0xd0] sm:$0xff]  ;;  %v610_v16 = vld [vmem:[%s1384_s23 + $0xa0] sm:$0xff] }
  0x80   : > { %446 = vmatprep.subr.mxu0 %v369_v18  ;;  %522 = vmatpush2.msra.mxu1 %v374_v41  ;;  %v339_v9 = vld [vmem:[%s1378_s7 + $0x218] sm:$0xff]  ;;  %v612_v14 = vld [vmem:[%s1384_s23 + $0xb0] sm:$0xff]  ;;  %v603_v23 = vld [vmem:[%s1384_s23 + $0x68] sm:$0xff] }
  0x81   : > { %447 = vmatpush2.msra.mxu0 %v368_v20  ;;  %523 = vmatprep.subr.mxu1 %v371_v43  ;;  %v613_v13 = vld [vmem:[%s1384_s23 + $0xb8] sm:$0xff]  ;;  %v608_v18 = vld [vmem:[%s1384_s23 + $0x90] sm:$0xff]  ;;  %v606_v20 = vld [vmem:[%s1384_s23 + $0x80] sm:$0xff] }
  0x82   : > { %448 = vmatprep.subr.mxu0 %v365_v22  ;;  %524 = vmatpush2.msra.mxu1 %v370_v45  ;;  %v609_v17 = vld [vmem:[%s1384_s23 + $0x98] sm:$0xff]  ;;  %v604_v22 = vld [vmem:[%s1384_s23 + $0x70] sm:$0xff]  ;;  %v599_v27 = vld [vmem:[%s1384_s23 + $0x48] sm:$0xff] }
  0x83   : > { %449 = vmatpush2.msra.mxu0 %v364_v24  ;;  %525 = vmatprep.subr.mxu1 %v367_v47  ;;  %v605_v21 = vld [vmem:[%s1384_s23 + $0x78] sm:$0xff]  ;;  %v602_v24 = vld [vmem:[%s1384_s23 + $0x60] sm:$0xff]  ;;  %v595_v31 = vld [vmem:[%s1384_s23 + $0x28] sm:$0xff] }
  0x84   : > { %450 = vmatprep.subr.mxu0 %v361_v26  ;;  %526 = vmatpush2.msra.mxu1 %v366_v49  ;;  %v601_v25 = vld [vmem:[%s1384_s23 + $0x58] sm:$0xff]  ;;  %v600_v26 = vld [vmem:[%s1384_s23 + $0x50] sm:$0xff]  ;;  %v591_v35 = vld [vmem:[%s1384_s23 + $0x8] sm:$0xff] }
  0x85   : > { %451 = vmatpush2.msra.mxu0 %v360_v28  ;;  %527 = vmatprep.subr.mxu1 %v363_v51  ;;  %v598_v28 = vld [vmem:[%s1384_s23 + $0x40] sm:$0xff]  ;;  %v597_v29 = vld [vmem:[%s1384_s23 + $0x38] sm:$0xff]  ;;  %v651_v39 = vld [vmem:[%s1384_s23 + $0x1e8] sm:$0xff] }
  0x86   : > { %452 = vmatprep.subr.mxu0 %v357_v30  ;;  %528 = vmatpush2.msra.mxu1 %v362_v53  ;;  %v596_v30 = vld [vmem:[%s1384_s23 + $0x30] sm:$0xff]  ;;  %v593_v33 = vld [vmem:[%s1384_s23 + $0x18] sm:$0xff]  ;;  %v647_v43 = vld [vmem:[%s1384_s23 + $0x1c8] sm:$0xff] }
  0x87   : > { %453 = vmatpush2.msra.mxu0 %v356_v32  ;;  %529 = vmatprep.subr.mxu1 %v359_v55  ;;  %v594_v32 = vld [vmem:[%s1384_s23 + $0x20] sm:$0xff]  ;;  %v653_v37 = vld [vmem:[%s1384_s23 + $0x1f8] sm:$0xff]  ;;  %v643_v47 = vld [vmem:[%s1384_s23 + $0x1a8] sm:$0xff] }
  0x88   : > { %454 = vmatprep.subr.mxu0 %v353_v34  ;;  %530 = vmatpush2.msra.mxu1 %v358_v57  ;;  %v592_v34 = vld [vmem:[%s1384_s23 + $0x10] sm:$0xff]  ;;  %v649_v41 = vld [vmem:[%s1384_s23 + $0x1d8] sm:$0xff]  ;;  %v639_v51 = vld [vmem:[%s1384_s23 + $0x188] sm:$0xff] }
  0x89   : > { %455 = vmatpush2.msra.mxu0 %v352_v36  ;;  %531 = vmatprep.subr.mxu1 %v355_v58  ;;  %v590_v36 = vld [vmem:[%s1384_s23] sm:$0xff]  ;;  %v645_v45 = vld [vmem:[%s1384_s23 + $0x1b8] sm:$0xff]  ;;  %v635_v55 = vld [vmem:[%s1384_s23 + $0x168] sm:$0xff] }
  0x8a   : > { %456 = vmatprep.subr.mxu0 %v349_v38  ;;  %541 = vmatprep.mubr.f32.mxu1 %v1461_v11  ;;  %v338_v11 = vld [vmem:[%s1378_s7 + $0x210] sm:$0xff]  ;;  %v641_v49 = vld [vmem:[%s1384_s23 + $0x198] sm:$0xff] }
  0x8b   : > { %457 = vmatpush2.msra.mxu0 %v348_v40  ;;  %532 = vmatpush2.msra.mxu1 %v354_v59  ;;  %v652_v38 = vld [vmem:[%s1384_s23 + $0x1f0] sm:$0xff]  ;;  %v650_v40 = vld [vmem:[%s1384_s23 + $0x1e0] sm:$0xff]  ;;  %v637_v53 = vld [vmem:[%s1384_s23 + $0x178] sm:$0xff] }
  0x8c   : > { %458 = vmatprep.subr.mxu0 %v345_v42  ;;  %533 = vmatprep.subr.mxu1 %v351_v62  ;;  %v648_v42 = vld [vmem:[%s1384_s23 + $0x1d0] sm:$0xff]  ;;  %v633_v57 = vld [vmem:[%s1384_s23 + $0x158] sm:$0xff]  ;;  %v631_v59 = vld [vmem:[%s1384_s23 + $0x148] sm:$0xff] }
  0x8d   : > { %459 = vmatpush2.msra.mxu0 %v344_v44  ;;  %534 = vmatpush2.msra.mxu1 %v350_v63  ;;  %v646_v44 = vld [vmem:[%s1384_s23 + $0x1c0] sm:$0xff]  ;;  %v632_v58 = vld [vmem:[%s1384_s23 + $0x150] sm:$0xff]  ;;  %v627_v63 = vld [vmem:[%s1384_s23 + $0x128] sm:$0xff] }
  0x8e   : > { %460 = vmatprep.subr.mxu0 %v341_v46  ;;  %535 = vmatprep.subr.mxu1 %v347_v1  ;;  %v644_v46 = vld [vmem:[%s1384_s23 + $0x1b0] sm:$0xff]  ;;  %v625_v1 = vld [vmem:[%s1384_s23 + $0x118] sm:$0xff] }
  0x8f   : > { %461 = vmatpush2.msra.mxu0 %v340_v48  ;;  %536 = vmatpush2.msra.mxu1 %v346_v3  ;;  %v642_v48 = vld [vmem:[%s1384_s23 + $0x1a0] sm:$0xff]  ;;  %v628_v62 = vld [vmem:[%s1384_s23 + $0x130] sm:$0xff]  ;;  %v623_v3 = vld [vmem:[%s1384_s23 + $0x108] sm:$0xff] }
  0x90   : > { %462 = vmatprep.subr.mxu0 %v337_v50  ;;  %537 = vmatprep.subr.mxu1 %v343_v5  ;;  %v640_v50 = vld [vmem:[%s1384_s23 + $0x190] sm:$0xff] }
  0x91   : > { %463 = vmatpush2.msra.mxu0 %v336_v52  ;;  %538 = vmatpush2.msra.mxu1 %v342_v7  ;;  %v638_v52 = vld [vmem:[%s1384_s23 + $0x180] sm:$0xff] }
  0x92   : > { %465 = vmatmul.mubr.f32.vlgmr.msra.gmra.mxu0 %v268_v54  ;;  %654 = vmatprep.subr.mxu0 %v621_v60 }
  0x93   : > { %470 = vmatprep.mubr.f32.mxu0 %v271_v56  ;;  %655 = vmatpush1.msra.mxu0 %v620_v0 }
  0x94   : > { %656 = vmatprep.subr.mxu0 %v619_v2  ;;  %539 = vmatprep.subr.mxu1 %v339_v9 }
  0x95   : > { %657 = vmatpush1.msra.mxu0 %v618_v4  ;;  %540 = vmatpush2.msra.mxu1 %v338_v11 }
  0x96   : > { %471 = vmatmul.mubr.f32.gmra.mxu0 %v270_v61  ;;  %658 = vmatprep.subr.mxu0 %v617_v6 }
  0x97   : > { %659 = vmatpush1.msra.mxu0 %v616_v8  ;;  %542 = vmatmul.mubr.f32.vlgmr.msra.gmra.mxu1 %v268_v54  ;;  %v636_v54 = vld [vmem:[%s1384_s23 + $0x170] sm:$0xff] }
  0x98   : > { %660 = vmatprep.subr.mxu0 %v615_v10  ;;  %887 = vmatprep.subr.mxu1 %v621_v60  ;;  %v630_v60 = vld [vmem:[%s1384_s23 + $0x140] sm:$0xff] }
  0x99   : > { %661 = vmatpush1.msra.mxu0 %v614_v12  ;;  %547 = vmatprep.mubr.f32.mxu1 %v271_v56  ;;  %v634_v56 = vld [vmem:[%s1384_s23 + $0x160] sm:$0xff] }
  0x9a   : > { %919 = vmatpush1.msra.mxu1 %v620_v0  ;;  %662 = vmatprep.subr.mxu0 %v613_v13  ;;  %v626_v0 = vld [vmem:[%s1384_s23 + $0x120] sm:$0xff] }
  0x9b   : > { %888 = vmatprep.subr.mxu1 %v619_v2  ;;  %663 = vmatpush1.msra.mxu0 %v612_v14  ;;  %v624_v2 = vld [vmem:[%s1384_s23 + $0x110] sm:$0xff] }
  0x9c   : > { %920 = vmatpush1.msra.mxu1 %v618_v4  ;;  %664 = vmatprep.subr.mxu0 %v611_v15  ;;  %v622_v4 = vld [vmem:[%s1384_s23 + $0x100] sm:$0xff] }
  0x9d   : > { %548 = vmatmul.mubr.f32.gmra.mxu1 %v270_v61  ;;  %889 = vmatprep.subr.mxu1 %v617_v6  ;;  %v629_v61 = vld [vmem:[%s1384_s23 + $0x138] sm:$0xff] }
  0x9e   : > { %921 = vmatpush1.msra.mxu1 %v616_v8  ;;  %665 = vmatpush1.msra.mxu0 %v610_v16 }
  0x9f   : > { %890 = vmatprep.subr.mxu1 %v615_v10  ;;  %666 = vmatprep.subr.mxu0 %v609_v17 }
  0xa0   : > { %922 = vmatpush1.msra.mxu1 %v614_v12  ;;  %667 = vmatpush1.msra.mxu0 %v608_v18 }
  0xa1   : > { %891 = vmatprep.subr.mxu1 %v613_v13  ;;  %668 = vmatprep.subr.mxu0 %v607_v19 }
  0xa2   : > { %923 = vmatpush1.msra.mxu1 %v612_v14  ;;  %669 = vmatpush1.msra.mxu0 %v606_v20 }
  0xa3   : > { %892 = vmatprep.subr.mxu1 %v611_v15  ;;  %670 = vmatprep.subr.mxu0 %v605_v21 }
  0xa4   : > { %924 = vmatpush1.msra.mxu1 %v610_v16  ;;  %671 = vmatpush1.msra.mxu0 %v604_v22 }
  0xa5   : > { %893 = vmatprep.subr.mxu1 %v609_v17  ;;  %672 = vmatprep.subr.mxu0 %v603_v23 }
  0xa6   : > { %925 = vmatpush1.msra.mxu1 %v608_v18  ;;  %673 = vmatpush1.msra.mxu0 %v602_v24 }
  0xa7   : > { %894 = vmatprep.subr.mxu1 %v607_v19  ;;  %674 = vmatprep.subr.mxu0 %v601_v25 }
  0xa8   : > { %926 = vmatpush1.msra.mxu1 %v606_v20  ;;  %675 = vmatpush1.msra.mxu0 %v600_v26 }
  0xa9   : > { %895 = vmatprep.subr.mxu1 %v605_v21  ;;  %676 = vmatprep.subr.mxu0 %v599_v27 }
  0xaa   : > { %927 = vmatpush1.msra.mxu1 %v604_v22  ;;  %677 = vmatpush1.msra.mxu0 %v598_v28 }
  0xab   : > { %896 = vmatprep.subr.mxu1 %v603_v23  ;;  %678 = vmatprep.subr.mxu0 %v597_v29 }
  0xac   : > { %928 = vmatpush1.msra.mxu1 %v602_v24  ;;  %679 = vmatpush1.msra.mxu0 %v596_v30 }
  0xad   : > { %897 = vmatprep.subr.mxu1 %v601_v25  ;;  %680 = vmatprep.subr.mxu0 %v595_v31 }
  0xae   : > { %929 = vmatpush1.msra.mxu1 %v600_v26  ;;  %681 = vmatpush1.msra.mxu0 %v594_v32 }
  0xaf   : > { %898 = vmatprep.subr.mxu1 %v599_v27  ;;  %682 = vmatprep.subr.mxu0 %v593_v33 }
  0xb0   : > { %930 = vmatpush1.msra.mxu1 %v598_v28  ;;  %683 = vmatpush1.msra.mxu0 %v592_v34 }
  0xb1   : > { %899 = vmatprep.subr.mxu1 %v597_v29  ;;  %684 = vmatprep.subr.mxu0 %v591_v35 }
  0xb2   : > { %931 = vmatpush1.msra.mxu1 %v596_v30  ;;  %685 = vmatpush1.msra.mxu0 %v590_v36 }
  0xb3   : > { %900 = vmatprep.subr.mxu1 %v595_v31  ;;  %686 = vmatprep.subr.mxu0 %v653_v37 }
  0xb4   : > { %932 = vmatpush1.msra.mxu1 %v594_v32  ;;  %687 = vmatpush2.msra.mxu0 %v652_v38 }
  0xb5   : > { %901 = vmatprep.subr.mxu1 %v593_v33  ;;  %688 = vmatprep.subr.mxu0 %v651_v39 }
  0xb6   : > { %933 = vmatpush1.msra.mxu1 %v592_v34  ;;  %689 = vmatpush2.msra.mxu0 %v650_v40 }
  0xb7   : > { %902 = vmatprep.subr.mxu1 %v591_v35  ;;  %690 = vmatprep.subr.mxu0 %v649_v41 }
  0xb8   : > { %934 = vmatpush1.msra.mxu1 %v590_v36  ;;  %691 = vmatpush2.msra.mxu0 %v648_v42 }
  0xb9   : > { %903 = vmatprep.subr.mxu1 %v653_v37  ;;  %692 = vmatprep.subr.mxu0 %v647_v43  ;;  %v586_v37 = vld [vmem:[#allocation2 + $0x10] sm:$0xff] }
  0xba   : > { %935 = vmatpush2.msra.mxu1 %v652_v38  ;;  %693 = vmatpush2.msra.mxu0 %v646_v44 }
  0xbb   : > { %904 = vmatprep.subr.mxu1 %v651_v39  ;;  %694 = vmatprep.subr.mxu0 %v645_v45  ;;  %v587_v39 = vld [vmem:[#allocation2] sm:$0xff] }
  0xbc   : > { %936 = vmatpush2.msra.mxu1 %v650_v40  ;;  %695 = vmatpush2.msra.mxu0 %v644_v46 }
  0xbd   : > { %905 = vmatprep.subr.mxu1 %v649_v41  ;;  %696 = vmatprep.subr.mxu0 %v643_v47 }
  0xbe   : > { %937 = vmatpush2.msra.mxu1 %v648_v42  ;;  %697 = vmatpush2.msra.mxu0 %v642_v48  ;;  %v588_v42 = vld [vmem:[#allocation2 + $0x18] sm:$0xff] }
  0xbf   : > { %906 = vmatprep.subr.mxu1 %v647_v43  ;;  %698 = vmatprep.subr.mxu0 %v641_v49 }
  0xc0   : > { %938 = vmatpush2.msra.mxu1 %v646_v44  ;;  %699 = vmatpush2.msra.mxu0 %v640_v50 }
  0xc1   : > { %907 = vmatprep.subr.mxu1 %v645_v45  ;;  %700 = vmatprep.subr.mxu0 %v639_v51  ;;  %v589_v45 = vld [vmem:[#allocation2 + $0x8] sm:$0xff] }
  0xc2   : > { %939 = vmatpush2.msra.mxu1 %v644_v46  ;;  %701 = vmatpush2.msra.mxu0 %v638_v52 }
  0xc3   : > { %908 = vmatprep.subr.mxu1 %v643_v47  ;;  %702 = vmatprep.subr.mxu0 %v637_v53 }
  0xc4   : > { %940 = vmatpush2.msra.mxu1 %v642_v48  ;;  %703 = vmatpush2.msra.mxu0 %v636_v54 }
  0xc5   : > { %909 = vmatprep.subr.mxu1 %v641_v49  ;;  %704 = vmatprep.subr.mxu0 %v635_v55 }
  0xc6   : > { %941 = vmatpush2.msra.mxu1 %v640_v50  ;;  %705 = vmatpush2.msra.mxu0 %v634_v56 }
  0xc7   : > { %910 = vmatprep.subr.mxu1 %v639_v51  ;;  %706 = vmatprep.subr.mxu0 %v633_v57 }
  0xc8   : > { %942 = vmatpush2.msra.mxu1 %v638_v52  ;;  %707 = vmatpush2.msra.mxu0 %v632_v58 }
  0xc9   : > { %911 = vmatprep.subr.mxu1 %v637_v53  ;;  %708 = vmatprep.subr.mxu0 %v631_v59 }
  0xca   : > { %943 = vmatpush2.msra.mxu1 %v636_v54  ;;  %709 = vmatpush2.msra.mxu0 %v630_v60 }
  0xcb   : > { %912 = vmatprep.subr.mxu1 %v635_v55  ;;  %710 = vmatprep.subr.mxu0 %v629_v61 }
  0xcc   : > { %944 = vmatpush2.msra.mxu1 %v634_v56  ;;  %711 = vmatpush2.msra.mxu0 %v628_v62 }
  0xcd   : > { %913 = vmatprep.subr.mxu1 %v633_v57  ;;  %712 = vmatprep.subr.mxu0 %v627_v63 }
  0xce   : > { %945 = vmatpush2.msra.mxu1 %v632_v58  ;;  %713 = vmatpush2.msra.mxu0 %v626_v0 }
  0xcf   : > { %914 = vmatprep.subr.mxu1 %v631_v59  ;;  %714 = vmatprep.subr.mxu0 %v625_v1 }
  0xd0   : > { %946 = vmatpush2.msra.mxu1 %v630_v60  ;;  %715 = vmatpush2.msra.mxu0 %v624_v2 }
  0xd1   : > { %915 = vmatprep.subr.mxu1 %v629_v61  ;;  %716 = vmatprep.subr.mxu0 %v623_v3 }
  0xd2   : > { %947 = vmatpush2.msra.mxu1 %v628_v62  ;;  %717 = vmatpush2.msra.mxu0 %v622_v4 }
  0xd3   : > { %916 = vmatprep.subr.mxu1 %v627_v63 }
  0xd4   : > { %948 = vmatpush2.msra.mxu1 %v626_v0 }
  0xd5   : > { %917 = vmatprep.subr.mxu1 %v625_v1 }
  0xd6   : > { %949 = vmatpush2.msra.mxu1 %v624_v2 }
  0xd7   : > { %918 = vmatprep.subr.mxu1 %v623_v3 }
  0xd8   : > { %950 = vmatpush2.msra.mxu1 %v622_v4 }
 0x152   : > { %v466_v5 = vpop.f32.mrf.mxu0 }
 0x153   : > { %v875_v6 = vmul.f32 -1.442695, %v466_v5 }
 0x154   : > { %v468_v7 = vpop.f32.mrf.mxu0 }
 0x155   : > { %1037 = vpow2.f32 %v875_v6  ;;  %v876_v8 = vmul.f32 -1.442695, %v468_v7 }
 0x156   : > { %v472_v9 = vpop.f32.mrf.mxu0 }
 0x157   : > { %1039 = vpow2.f32 %v876_v8  ;;  %v877_v10 = vmul.f32 -1.442695, %v472_v9  ;;  %v543_v21 = vpop.f32.mrf.mxu1 }
 0x158   : > { %v474_v11 = vpop.f32.mrf.mxu0 }
 0x159   : > { %1041 = vpow2.f32 %v877_v10  ;;  %v878_v12 = vmul.f32 -1.442695, %v474_v11  ;;  %v545_v23 = vpop.f32.mrf.mxu1 }
 0x15b   : > { %1043 = vpow2.f32 %v878_v12 }
 0x15d   : > { %v549_v28 = vpop.f32.mrf.mxu1 }
 0x15f   : > { %v551_v34 = vpop.f32.mrf.mxu1 }
 0x162   : > { %v1038_v13 = vpop.eup %1037 }
 0x163   : > { %v566_v14 = vadd.f32 1.0, %v1038_v13 }
 0x164   : > { %v1040_v15 = vpop.eup %1039 }
 0x165   : > { %1045 = vrcp.f32 %v566_v14  ;;  %v567_v16 = vadd.f32 1.0, %v1040_v15 }
 0x166   : > { %v1042_v17 = vpop.eup %1041 }
 0x167   : > { %1047 = vrcp.f32 %v567_v16  ;;  %v568_v18 = vadd.f32 1.0, %v1042_v17 }
 0x168   : > { %v1044_v19 = vpop.eup %1043 }
 0x169   : > { %1049 = vrcp.f32 %v568_v18  ;;  %v569_v20 = vadd.f32 1.0, %v1044_v19 }
 0x16b   : > { %1051 = vrcp.f32 %v569_v20 }
 0x172   : > { %v1046_v22 = vpop.eup %1045 }
 0x173   : > { %v578_v25 = vmul.f32 %v1046_v22, %v466_v5 }
 0x174   : > { %v1048_v24 = vpop.eup %1047 }
 0x175   : > { %v579_v26 = vmul.f32 %v1048_v24, %v468_v7  ;;  %v582_v32 = vmul.f32 %v578_v25, %v543_v21 }
 0x176   : > { %v1050_v27 = vpop.eup %1049 }
 0x177   : > { %v583_v29 = vmul.f32 %v579_v26, %v545_v23  ;;  %v580_v31 = vmul.f32 %v1050_v27, %v472_v9 }
 0x178   : > { %v1052_v30 = vpop.eup %1051 }
 0x179   : > { %v581_v33 = vmul.f32 %v1052_v30, %v474_v11  ;;  %718 = vmatprep.mubr.f32.mxu0 %v583_v29  ;;  %v584_v36 = vmul.f32 %v580_v31, %v549_v28 }
 0x17a   : > { %719 = vmatmul.mubr.f32.vlgmr.msra.gmra.mxu0 %v582_v32 }
 0x17b   : > { %v585_v35 = vmul.f32 %v581_v33, %v551_v34 }
 0x17d   : > { %724 = vmatprep.mubr.f32.mxu1 %v585_v35 }
 0x17e   : > { %725 = vmatmul.mubr.f32.vlgmr.msra.gmra.mxu1 %v584_v36 }
 0x23a   : > { %v720_v38 = vpop.f32.mrf.mxu0 }
 0x23b   : > { %v731_v40 = vadd.f32 %v720_v38, %v586_v37 }
 0x23c   : > { %v722_v41 = vpop.f32.mrf.mxu0 }
 0x23d   : > { %735 = vst [vmem:[#allocation2 + $0x10] sm:$0xff] %v731_v40  ;;  %v732_v43 = vadd.f32 %v722_v41, %v587_v39 }
 0x23e   : > { %v726_v44 = vpop.f32.mrf.mxu1 }
 0x23f   : > { %736 = vst [vmem:[#allocation2] sm:$0xff] %v732_v43  ;;  %v733_v46 = vadd.f32 %v726_v44, %v588_v42  ;;  %742 = sbr.rel (%p879_p7) target bundleno = 588 (0x24c), region = 52 }
 0x240   : > { %v728_v47 = vpop.f32.mrf.mxu1 }
 0x241   : > { %737 = vst [vmem:[#allocation2 + $0x18] sm:$0xff] %v733_v46  ;;  %v734_v48 = vadd.f32 %v728_v47, %v589_v45 }
 0x243   : > { %738 = vst [vmem:[#allocation2 + $0x8] sm:$0xff] %v734_v48 }
 0x244   : > { %v743_v49 = vld [vmem:[#allocation2 + $0x10] sm:$0xff] }
 0x245   : > { %747 = vst [vmem:[#allocation9] sm:$0xff] %v743_v49 }
 0x246   : > { %v744_v50 = vld [vmem:[#allocation2] sm:$0xff] }
 0x247   : > { %748 = vst [vmem:[#allocation9 + $0x8] sm:$0xff] %v744_v50 }
 0x248   : > { %v745_v51 = vld [vmem:[#allocation2 + $0x18] sm:$0xff] }
 0x249   : > { %749 = vst [vmem:[#allocation9 + $0x10] sm:$0xff] %v745_v51 }
 0x24a   : > { %v746_v52 = vld [vmem:[#allocation2 + $0x8] sm:$0xff] }
 0x24b   : > { %750 = vst [vmem:[#allocation9 + $0x18] sm:$0xff] %v746_v52 }
 0x24c PF: > { %p977_p2 = scmp.eq.s32.totalorder %s1317_s20, 1  ;;  %s1228_s21 = smov [#allocation9]  }
 0x24d   : > { %s761_s6 = sshll.u32 %s1228_s21, 4  ;;  %s762_s6 = int_to_ptr.vmem [resolvable:$true] %s761_s6 }
 0x24e   : > { %s1135_s8 = scalar_lea.vmem %s762_s6, 512  ;;  %p1142_p9 = scmp.lt.s32.totalorder %s762_s6, %s762_s6 }
 0x24f   : > { %p1136_p5 = scmp.ne.s32.totalorder %s762_s6, %s1135_s8  ;;  %p1143_p11 = scmp.lt.s32.totalorder %s1135_s8, %s1135_s8 }
 0x251   : > { %p1137_p8 = pnand %p1136_p5, %p977_p2  ;;  %p1144_p12 = por %p1143_p11, %p1142_p9 }
 0x253   : > { %p1138_p10 = pneg %p1137_p8 }
 0x255   : > { %p1145_p13 = pnand %p1144_p12, %p1138_p10 }
 0x257   : > { %1148 = shalt.err (!%p1145_p13)
}
 0x258   : > { %s1229_s15 = smov 256   ;;  %s1230_s9 = smov 16  }
 0x259   : > { %960 = dma.vmem_to_hbm [thread:$0]  (%p977_p2), %s762_s6, 512, %s1617_s3, [#allocation5], %s1229_s15, %s1229_s15, %s1230_s9  }
 0x25a   : > { %1192 = dma.done.wait (%p977_p2), [#allocation5], 512  }
 0x25b   : > { %1194 = vsyncadd (%p977_p2), [#allocation5], 4294966784 }
 0x25c PF: > { %s18_s17 = sadd.s32 1, %s1217_s17   ;;  %s1622_s12 = smov %s1201_s13 }
 0x25d   : > { %p15_p0 = scmp.ge.s32.totalorder %s18_s17, 4   ;;  %s1623_s13 = smov %s1205_s14 }
 0x25e   : > { %s1624_s14 = smov %s1295_s24  ;;  %s1625_s15 = smov %s1213_s16 }
 0x25f   : > { %s1626_s16 = smov %s1628_s18  ;;  %17 = sbr.rel (!%p15_p0) target bundleno = 6 (0x6), region = 95 }
 0x264   :  { %777 = vsyncpa [#allocation4], 1 }
 0x265   :  { %779 = vsyncpa [#allocation4 + $0x1], 1 }
 0x266   :  { %780 = vsyncpa [#allocation7], 1 }
 0x267   :  { %782 = vsyncpa [#allocation7 + $0x1], 1 }
 0x268   :  { %783 = vsyncpa [#allocation5], 1 }
 0x269   :  { %785 = vsyncpa [#allocation5 + $0x1], 1 }

</bundles_post_ra>
